<compile_context>
chip_gen: v6e
topology: v6e:2x2x1
jax: 0.10.0
libtpu: 0.0.40
codegen_flags: <defaults>
</compile_context>

<pallas_src>
import numpy as np
import jax
import jax.numpy as jnp
from jax import lax
from jax.experimental import pallas as pl
from jax.experimental.pallas import tpu as pltpu


# ----------------------------------------------------------------------------
# Deterministic parameter init (port of orthonormal_initializer)
# ----------------------------------------------------------------------------
def orthonormal_initializer(output_size, input_size, seed=0):
    rng = np.random.RandomState(seed)
    I = np.eye(output_size)
    lr = 0.1
    eps = 0.05 / (output_size + input_size)
    success = False
    tries = 0
    Q = rng.randn(input_size, output_size) / np.sqrt(output_size)
    while not success and tries < 10:
        Q = rng.randn(input_size, output_size) / np.sqrt(output_size)
        for _ in range(100):
            QTQmI = Q.T.dot(Q) - I
            loss = np.sum(QTQmI ** 2 / 2)
            Q2 = Q ** 2
            Q -= lr * Q.dot(QTQmI) / (
                np.abs(Q2 + Q2.sum(axis=0, keepdims=True) + Q2.sum(axis=1, keepdims=True) - 1) + eps
            )
            if np.max(Q) > 1e6 or loss > 1e6 or (not np.isfinite(loss)):
                tries += 1
                lr /= 2
                break
        else:
            success = True
    if not success:
        Q = rng.randn(input_size, output_size) / np.sqrt(output_size)
    return np.transpose(Q.astype(np.float32))  # [output_size, input_size]


# ----------------------------------------------------------------------------
# Pallas kernel: y = activate(x @ W.T + b), tiled over (M, H, K)
# ----------------------------------------------------------------------------
def _nonlinear_kernel(x_ref, w_ref, b_ref, o_ref, acc_ref, *, activation):
    # x_ref:   (tm, tk)  input tile
    # w_ref:   (tn, tk)  weight tile in nn.Linear layout [hidden, input]
    # b_ref:   (1,  tn)  bias tile
    # o_ref:   (tm, tn)  output tile (resident across the K axis)
    # acc_ref: (tm, tn)  f32 accumulator scratch
    k = pl.program_id(2)

    @pl.when(k == 0)
    def _():
        acc_ref[...] = jnp.zeros_like(acc_ref)

    # Contract x's K dim (axis 1) against w's K dim (axis 1): (tm,tk)x(tn,tk)->(tm,tn).
    acc_ref[...] += lax.dot_general(
        x_ref[...],
        w_ref[...],
        dimension_numbers=(((1,), (1,)), ((), ())),
        preferred_element_type=jnp.float32,
    )

    @pl.when(k == pl.num_programs(2) - 1)
    def _():
        y = acc_ref[...] + b_ref[...]          # broadcast (1, tn) over (tm, tn)
        o_ref[...] = activation(y).astype(o_ref.dtype)


def _round_up(v, m):
    return ((v + m - 1) // m) * m


def nonlinear_forward(x, weight, bias, activation=None, *,
                      tile_m=512, tile_n=512, tile_k=512):
    """NonLinear forward pass.

    x:      [..., input_size] float32
    weight: [hidden_size, input_size] float32 (nn.Linear.weight layout)
    bias:   [hidden_size] float32
    """
    if activation is None:
        activation = lambda v: v

    in_shape = x.shape
    K = in_shape[-1]
    H = weight.shape[0]
    x2d = x.reshape(-1, K)
    M = x2d.shape[0]

    # Tile sizes: large, MXU/lane friendly, but no bigger than the (padded) data.
    tm = min(tile_m, _round_up(M, 8))       # sublane axis: multiple of 8
    tn = min(tile_n, _round_up(H, 128))     # lane axis: multiple of 128 (dense stores)
    tk = min(tile_k, _round_up(K, 128))     # lane axis of x / weight: multiple of 128

    M_pad = _round_up(M, tm)
    H_pad = _round_up(H, tn)
    K_pad = _round_up(K, tk)

    if (M_pad, K_pad) != (M, K):
        x2d = jnp.pad(x2d, ((0, M_pad - M), (0, K_pad - K)))
    w_p = weight
    if (H_pad, K_pad) != (H, K):
        w_p = jnp.pad(weight, ((0, H_pad - H), (0, K_pad - K)))
    b_row = bias
    if H_pad != H:
        b_row = jnp.pad(bias, (0, H_pad - H))
    b_row = b_row.reshape(1, H_pad)

    grid = (M_pad // tm, H_pad // tn, K_pad // tk)

    out = pl.pallas_call(
        lambda xr, wr, br, orf, acc: _nonlinear_kernel(
            xr, wr, br, orf, acc, activation=activation),
        out_shape=jax.ShapeDtypeStruct((M_pad, H_pad), x.dtype),
        grid_spec=pltpu.PrefetchScalarGridSpec(
            num_scalar_prefetch=0,
            grid=grid,
            in_specs=[
                pl.BlockSpec((tm, tk), lambda i, j, k: (i, k)),   # x row/K tile
                pl.BlockSpec((tn, tk), lambda i, j, k: (j, k)),   # weight [H,K] tile
                pl.BlockSpec((1, tn), lambda i, j, k: (0, j)),    # bias tile
            ],
            out_specs=pl.BlockSpec((tm, tn), lambda i, j, k: (i, j)),
            scratch_shapes=[pltpu.VMEM((tm, tn), jnp.float32)],
        ),
        compiler_params=pltpu.CompilerParams(
            dimension_semantics=("parallel", "parallel", "arbitrary"),
        ),
    )(x2d, w_p, b_row)

    out = out[:M, :H]
    return out.reshape(*in_shape[:-1], H)


# ----------------------------------------------------------------------------
# Demo / correctness check
# ----------------------------------------------------------------------------
if __name__ == "__main__":
    batch, seq, input_size, hidden_size = 2, 8, 32, 32

    # Deterministic params (same shapes as the PyTorch module's __init__).
    W_np = orthonormal_initializer(hidden_size, input_size, seed=0)  # [H, K]
    b_np = np.zeros(hidden_size, dtype=np.float32)

    weight = jnp.asarray(W_np)
    bias = jnp.asarray(b_np)

    key = jax.random.PRNGKey(0)
    x = jax.random.normal(key, (batch, seq, input_size), dtype=jnp.float32)

    # Default module behaviour: activation=None -> identity.
    y = nonlinear_forward(x, weight, bias, activation=None)
    y = jax.block_until_ready(y)

    # Reference in plain JAX (matches nn.Linear semantics: x @ W.T + b).
    y_ref = jnp.einsum("bsk,hk->bsh", x, weight) + bias
    assert y.shape == (batch, seq, hidden_size)
    np.testing.assert_allclose(np.asarray(y), np.asarray(y_ref), rtol=1e-5, atol=1e-5)

    # Non-trivial activation (module accepts any callable).
    y_act = nonlinear_forward(x, weight, bias, activation=jax.nn.leaky_relu)
    y_act = jax.block_until_ready(y_act)
    np.testing.assert_allclose(
        np.asarray(y_act), np.asarray(jax.nn.leaky_relu(y_ref)), rtol=1e-5, atol=1e-5
    )

    # Exercise a shape that actually tiles over all three grid axes
    # (M, H, K > one tile) to validate the accumulator path.
    K2, H2 = 640, 384
    W2 = jax.random.normal(jax.random.PRNGKey(1), (H2, K2), dtype=jnp.float32) * 0.02
    b2 = jax.random.normal(jax.random.PRNGKey(2), (H2,), dtype=jnp.float32) * 0.1
    x2 = jax.random.normal(jax.random.PRNGKey(3), (4, 300, K2), dtype=jnp.float32)
    y2 = nonlinear_forward(x2, W2, b2, activation=jnp.tanh, tile_m=256, tile_n=256, tile_k=256)
    y2 = jax.block_until_ready(y2)
    y2_ref = jnp.tanh(jnp.einsum("bsk,hk->bsh", x2, W2) + b2)
    np.testing.assert_allclose(np.asarray(y2), np.asarray(y2_ref), rtol=1e-4, atol=1e-4)

    print("KERNEL_OK")
</pallas_src>

<mosaic_0001>
module attributes {stable_mosaic.version = 11 : i64} {
  func.func @_lambda_(%arg0: i32, %arg1: i32, %arg2: i32, %arg3: memref<16x128xf32, #tpu.memory_space<vmem>>, %arg4: memref<128x128xf32, #tpu.memory_space<vmem>>, %arg5: memref<1x128xf32, #tpu.memory_space<vmem>>, %arg6: memref<16x128xf32, #tpu.memory_space<vmem>>, %arg7: memref<16x128xf32, #tpu.memory_space<vmem>>) attributes {dimension_semantics = [#tpu.dimension_semantics<parallel>, #tpu.dimension_semantics<parallel>, #tpu.dimension_semantics<arbitrary>], iteration_bounds = array<i64: 1, 1, 1>, scalar_prefetch = 0 : i64, scratch_operands = 1 : i64, tpu.core_type = #tpu.core_type<tc>, window_params = [{transform_indices = @transform_0, window_bounds = array<i64: 16, 128>}, {transform_indices = @transform_1, window_bounds = array<i64: 128, 128>}, {transform_indices = @transform_2, window_bounds = array<i64: 1, 128>}, {transform_indices = @transform_3, window_bounds = array<i64: 16, 128>}]} {
    %c0_i32 = arith.constant 0 : i32
    %0 = arith.cmpi eq, %arg2, %c0_i32 : i32
    %1 = arith.extui %0 : i1 to i32
    %c0_i32_0 = arith.constant 0 : i32
    %2 = arith.cmpi ne, %1, %c0_i32_0 : i32
    scf.if %2 {
      %cst_10 = arith.constant 0.000000e+00 : f32
      %12 = vector.broadcast %cst_10 : f32 to vector<16x128xf32>
      %c0_11 = arith.constant 0 : index
      %c0_12 = arith.constant 0 : index
      %13 = vector.load %arg7[%c0_11, %c0_12] : memref<16x128xf32, #tpu.memory_space<vmem>>, vector<16x128xf32>
      tpu.vector_store %arg7[%c0_11, %c0_12], %12 {strides = array<i32>} : memref<16x128xf32, #tpu.memory_space<vmem>>, vector<16x128xf32>,
    } else {
    }
    %c0 = arith.constant 0 : index
    %c0_1 = arith.constant 0 : index
    %3 = vector.load %arg7[%c0, %c0_1] : memref<16x128xf32, #tpu.memory_space<vmem>>, vector<16x128xf32>
    %c0_2 = arith.constant 0 : index
    %c0_3 = arith.constant 0 : index
    %4 = vector.load %arg3[%c0_2, %c0_3] : memref<16x128xf32, #tpu.memory_space<vmem>>, vector<16x128xf32>
    %c0_4 = arith.constant 0 : index
    %c0_5 = arith.constant 0 : index
    %5 = vector.load %arg4[%c0_4, %c0_5] : memref<128x128xf32, #tpu.memory_space<vmem>>, vector<128x128xf32>
    %cst = arith.constant dense<0.000000e+00> : vector<16x128xf32>
    %6 = tpu.matmul %4, %5, %cst {dimension_numbers = #tpu.dot_dimension_numbers<[1], [1], [0], [0], [0, 0, 1, 0], [], []>} : vector<16x128xf32>, vector<128x128xf32>, vector<16x128xf32> -> vector<16x128xf32>
    %7 = arith.addf %3, %6 : vector<16x128xf32>
    %c0_6 = arith.constant 0 : index
    %c0_7 = arith.constant 0 : index
    %8 = vector.load %arg7[%c0_6, %c0_7] : memref<16x128xf32, #tpu.memory_space<vmem>>, vector<16x128xf32>
    tpu.vector_store %arg7[%c0_6, %c0_7], %7 {strides = array<i32>} : memref<16x128xf32, #tpu.memory_space<vmem>>, vector<16x128xf32>,
    %c0_i32_8 = arith.constant 0 : i32
    %9 = arith.cmpi eq, %arg2, %c0_i32_8 : i32
    %10 = arith.extui %9 : i1 to i32
    %c0_i32_9 = arith.constant 0 : i32
    %11 = arith.cmpi ne, %10, %c0_i32_9 : i32
    scf.if %11 {
      %c0_10 = arith.constant 0 : index
      %c0_11 = arith.constant 0 : index
      %12 = vector.load %arg7[%c0_10, %c0_11] : memref<16x128xf32, #tpu.memory_space<vmem>>, vector<16x128xf32>
      %c0_12 = arith.constant 0 : index
      %c0_13 = arith.constant 0 : index
      %13 = vector.load %arg5[%c0_12, %c0_13] : memref<1x128xf32, #tpu.memory_space<vmem>>, vector<1x128xf32>
      %14 = vector.broadcast %13 : vector<1x128xf32> to vector<16x128xf32>
      %15 = arith.addf %12, %14 : vector<16x128xf32>
      %c0_14 = arith.constant 0 : index
      %c0_15 = arith.constant 0 : index
      %16 = vector.load %arg6[%c0_14, %c0_15] : memref<16x128xf32, #tpu.memory_space<vmem>>, vector<16x128xf32>
      tpu.vector_store %arg6[%c0_14, %c0_15], %15 {strides = array<i32>} : memref<16x128xf32, #tpu.memory_space<vmem>>, vector<16x128xf32>,
    } else {
    }
    return
  }
  func.func @transform_0(%arg0: i32, %arg1: i32, %arg2: i32) -> (i32, i32) {
    %c0_i32 = arith.constant 0 : i32
    return %arg0, %arg2 : i32, i32
  }
  func.func @transform_1(%arg0: i32, %arg1: i32, %arg2: i32) -> (i32, i32) {
    %c0_i32 = arith.constant 0 : i32
    return %arg1, %arg2 : i32, i32
  }
  func.func @transform_2(%arg0: i32, %arg1: i32, %arg2: i32) -> (i32, i32) {
    %c0_i32 = arith.constant 0 : i32
    %c0_i32_0 = arith.constant 0 : i32
    return %c0_i32, %arg1 : i32, i32
  }
  func.func @transform_3(%arg0: i32, %arg1: i32, %arg2: i32) -> (i32, i32) {
    %c0_i32 = arith.constant 0 : i32
    return %arg0, %arg1 : i32, i32
  }
}

</mosaic_0001>

<bundles_post_ra>
// kernel: tpu_custom_call.1
= control target key start
LH: loop header
LB: loop body
LE: loop exit
PB: predicated region body
PF: predicated region fallthrough
CT: control target
= control target key end

     0   :  { %8 = vsyncpa [#allocation4], 0  ;;  %s353_s0 = inlined_call_operand.hbm [shape: f32[16,128], index: 0, kind: input, shape index: {}]   ;;  %s354_s1 = inlined_call_operand.hbm [shape: f32[128,128], index: 1, kind: input, shape index: {}]   ;;  %s355_s2 = inlined_call_operand.vmem [shape: f32[1,128], index: 2, kind: input, shape index: {}]   ;;  %s356_s3 = inlined_call_operand.hbm [shape: f32[16,128], index: 3, kind: output, shape index: {}]  }
   0x1   :  { %9 = vsyncpa [#allocation7], 0 }
   0x2   :  { %10 = vsyncpa [#allocation5], 0  ;;  %s307_s12 = smov [#allocation3]  }
   0x3   :  { %s16_s13 = sshll.u32 %s307_s12, 4  ;;  %s17_s13 = int_to_ptr.vmem [resolvable:$true] %s16_s13 }
   0x4   :  { %s249_s14 = scalar_lea.vmem %s17_s13, 256  ;;  %p254_p1 = scmp.lt.s32.totalorder %s17_s13, %s17_s13 }
   0x5   :  { %p250_p0 = scmp.ne.s32.totalorder %s17_s13, %s249_s14  ;;  %p255_p2 = scmp.lt.s32.totalorder %s249_s14, %s249_s14 }
   0x7   :  { %p256_p3 = por %p255_p2, %p254_p1 }
   0x9   :  { %p257_p4 = pnand %p256_p3, %p250_p0 }
   0xb   :  { %260 = shalt.err (!%p257_p4)
}
   0xc   :  { %s308_s15 = smov 128   ;;  %s309_s16 = smov 8  }
   0xd   :  { %22 = dma.hbm_to_vmem [thread:$0]  %s353_s0, 256, %s17_s13, [#allocation4], %s308_s15, %s308_s15, %s309_s16  }
   0xe   :  { %s310_s19 = smov [#allocation6]  }
   0xf   :  { %s28_s20 = sshll.u32 %s310_s19, 4  ;;  %s29_s20 = int_to_ptr.vmem [resolvable:$true] %s28_s20 }
  0x10   :  { %s269_s21 = scalar_lea.vmem %s29_s20, 2048  ;;  %p274_p6 = scmp.lt.s32.totalorder %s29_s20, %s29_s20 }
  0x11   :  { %p270_p5 = scmp.ne.s32.totalorder %s29_s20, %s269_s21  ;;  %p275_p7 = scmp.lt.s32.totalorder %s269_s21, %s269_s21 }
  0x13   :  { %p276_p8 = por %p275_p7, %p274_p6 }
  0x15   :  { %p277_p9 = pnand %p276_p8, %p270_p5 }
  0x17   :  { %280 = shalt.err (!%p277_p9)
}
  0x18   :  { %34 = dma.hbm_to_vmem [thread:$0]  %s354_s1, 2048, %s29_s20, [#allocation7], %s308_s15, %s308_s15, %s309_s16  }
  0x19   :  { %301 = dma.done.wait [#allocation4], 256  }
  0x1a   :  { %302 = vsyncadd [#allocation4], 4294967040 }
  0x1b   :  { %303 = dma.done.wait [#allocation7], 2048  }
  0x1c   :  { %304 = vsyncadd [#allocation7], 4294965248  ;;  %v68_v0 = vld [vmem:[#allocation6 + $0x78] sm:$0xff]  ;;  %v67_v1 = vld [vmem:[#allocation6 + $0x70] sm:$0xff]  ;;  %s311_s24 = smov [#allocation8]  }
  0x1d   :  { %201 = vmatprep.subr.mxu0 %v68_v0  ;;  %v66_v2 = vld [vmem:[#allocation6 + $0x68] sm:$0xff]  ;;  %v51_v3 = vld [vmem:[#allocation3] sm:$0xff]  ;;  %v65_v4 = vld [vmem:[#allocation6 + $0x60] sm:$0xff]  ;;  %s169_s25 = sshll.u32 %s311_s24, 4  ;;  %s170_s25 = int_to_ptr.vmem [resolvable:$true] %s169_s25 }
  0x1e   :  { %202 = vmatpush3.xpose.msra.mxu0 %v68_v0  ;;  %233 = vmatprep.mubr.f32.mxu0 %v51_v3  ;;  %v64_v5 = vld [vmem:[#allocation6 + $0x58] sm:$0xff]  ;;  %v63_v6 = vld [vmem:[#allocation6 + $0x50] sm:$0xff]  ;;  %v62_v7 = vld [vmem:[#allocation6 + $0x48] sm:$0xff]  ;;  %s281_s26 = scalar_lea.vmem %s170_s25, 256  ;;  %p286_p11 = scmp.lt.s32.totalorder %s170_s25, %s170_s25 }
  0x1f   :  { %203 = vmatprep.subr.mxu0 %v67_v1  ;;  %v61_v8 = vld [vmem:[#allocation6 + $0x40] sm:$0xff]  ;;  %v60_v9 = vld [vmem:[#allocation6 + $0x38] sm:$0xff]  ;;  %v59_v10 = vld [vmem:[#allocation6 + $0x30] sm:$0xff]  ;;  %p282_p10 = scmp.ne.s32.totalorder %s170_s25, %s281_s26  ;;  %p287_p12 = scmp.lt.s32.totalorder %s281_s26, %s281_s26 }
  0x20   :  { %v58_v11 = vld [vmem:[#allocation6 + $0x28] sm:$0xff]  ;;  %v57_v12 = vld [vmem:[#allocation6 + $0x20] sm:$0xff]  ;;  %v56_v13 = vld [vmem:[#allocation6 + $0x18] sm:$0xff] }
  0x21   :  { %v55_v14 = vld [vmem:[#allocation6 + $0x10] sm:$0xff]  ;;  %v54_v15 = vld [vmem:[#allocation6 + $0x8] sm:$0xff]  ;;  %v53_v16 = vld [vmem:[#allocation6] sm:$0xff]  ;;  %p288_p13 = por %p287_p12, %p286_p11 }
  0x22   :  { %204 = vmatpush3.xpose.msra.mxu0 %v67_v1  ;;  %v52_v17 = vld [vmem:[#allocation3 + $0x8] sm:$0xff]  ;;  %v182_v18 = vld [vmem:[%s355_s2] ss:$0 sm:$0xff] }
  0x23   :  { %205 = vmatprep.subr.mxu0 %v66_v2  ;;  %p289_p0 = pnand %p288_p13, %p282_p10 }
  0x26   :  { %206 = vmatpush3.xpose.msra.mxu0 %v66_v2 }
  0x27   :  { %207 = vmatprep.subr.mxu0 %v65_v4 }
  0x2a   :  { %208 = vmatpush3.xpose.msra.mxu0 %v65_v4 }
  0x2b   :  { %209 = vmatprep.subr.mxu0 %v64_v5 }
  0x2e   :  { %210 = vmatpush3.xpose.msra.mxu0 %v64_v5 }
  0x2f   :  { %211 = vmatprep.subr.mxu0 %v63_v6 }
  0x32   :  { %212 = vmatpush3.xpose.msra.mxu0 %v63_v6 }
  0x33   :  { %213 = vmatprep.subr.mxu0 %v62_v7 }
  0x36   :  { %214 = vmatpush3.xpose.msra.mxu0 %v62_v7 }
  0x37   :  { %215 = vmatprep.subr.mxu0 %v61_v8 }
  0x3a   :  { %216 = vmatpush3.xpose.msra.mxu0 %v61_v8 }
  0x3b   :  { %217 = vmatprep.subr.mxu0 %v60_v9 }
  0x3e   :  { %218 = vmatpush3.xpose.msra.mxu0 %v60_v9 }
  0x3f   :  { %219 = vmatprep.subr.mxu0 %v59_v10 }
  0x42   :  { %220 = vmatpush3.xpose.msra.mxu0 %v59_v10 }
  0x43   :  { %221 = vmatprep.subr.mxu0 %v58_v11 }
  0x46   :  { %222 = vmatpush3.xpose.msra.mxu0 %v58_v11 }
  0x47   :  { %223 = vmatprep.subr.mxu0 %v57_v12 }
  0x4a   :  { %224 = vmatpush3.xpose.msra.mxu0 %v57_v12 }
  0x4b   :  { %225 = vmatprep.subr.mxu0 %v56_v13 }
  0x4e   :  { %226 = vmatpush3.xpose.msra.mxu0 %v56_v13 }
  0x4f   :  { %227 = vmatprep.subr.mxu0 %v55_v14 }
  0x52   :  { %228 = vmatpush3.xpose.msra.mxu0 %v55_v14 }
  0x53   :  { %229 = vmatprep.subr.mxu0 %v54_v15 }
  0x56   :  { %230 = vmatpush3.xpose.msra.mxu0 %v54_v15 }
  0x57   :  { %231 = vmatprep.subr.mxu0 %v53_v16 }
  0x5a   :  { %232 = vmatpush3.xpose.msra.mxu0 %v53_v16 }
  0x5d   :  { %234 = vmatmul.mubr.f32.vlgmr.msra.gmra.mxu0 %v52_v17 }
 0x11d   :  { %v235_v19 = vpop.f32.mrf.mxu0 }
 0x11e   :  { %v161_v20 = vadd.f32 %v235_v19, %v182_v18 }
 0x11f   :  { %v135_v21 = vpop.f32.mrf.mxu0 }
 0x120   :  { %163 = vst [vmem:[#allocation8 + $0x8] sm:$0xff] %v161_v20  ;;  %v160_v22 = vadd.f32 %v182_v18, %v135_v21 }
 0x122   :  { %162 = vst [vmem:[#allocation8] sm:$0xff] %v160_v22 }
 0x123   :  { %292 = shalt.err (!%p289_p0)
}
 0x124   :  { %175 = dma.vmem_to_hbm [thread:$0]  %s170_s25, 256, %s356_s3, [#allocation5], %s308_s15, %s308_s15, %s309_s16  }
 0x125   :  { %305 = dma.done.wait [#allocation5], 256  }
 0x126   :  { %306 = vsyncadd [#allocation5], 4294967040 }
 0x127   :  { %179 = vsyncpa [#allocation4], 1 }
 0x128   :  { %180 = vsyncpa [#allocation7], 1 }
 0x129   :  { %181 = vsyncpa [#allocation5], 1 }

</bundles_post_ra>
